<compile_context>
chip_gen: v5e
topology: v5e:2x2
jax: 0.10.0
libtpu: 0.0.40
codegen_flags: <defaults>
</compile_context>

<pallas_src>
import functools

import jax
import jax.numpy as jnp
from jax.experimental import pallas as pl
from jax.experimental.pallas import tpu as pltpu


# ----------------------------------------------------------------------------
# Reference (pure XLA) implementation — also used as a tiny-shape fallback.
# ----------------------------------------------------------------------------
def _xla_reference(x, weight, bias, *, dilation, padding):
    out = jax.lax.conv_general_dilated(
        x, weight, window_strides=(1,), padding=[(padding, padding)],
        rhs_dilation=(dilation,), dimension_numbers=("NCH", "OIH", "NCH"))
    return jnp.maximum(out + bias[None, :, None], 0.0)


def _tpu_vmem_capacity_bytes():
    """VMEM capacity of the current TPU generation; conservative on failure."""
    try:
        return int(pltpu.get_tpu_info().vmem_capacity_bytes)
    except Exception:
        return 64 * 1024 * 1024  # v7x-sized assumption: always safe.


def _estimate_vmem_bytes(l_tile, halo_blk, c_in, c_out_tile, k, in_bytes, out_bytes):
    """Rough per-pipeline-stage VMEM use: double-buffered operands + body temps."""
    bufs = 2 * (c_in * (l_tile + halo_blk) * in_bytes      # x current + halo sliver
                + k * c_out_tile * c_in * in_bytes          # weights (tap-major)
                + c_out_tile * 4                            # bias (f32)
                + c_out_tile * l_tile * out_bytes)          # output tile
    temps = (c_in * (l_tile + halo_blk) * in_bytes          # concatenated window
             + max(k - 1, 0) * c_in * l_tile * in_bytes     # per-tap shifted views
             + c_out_tile * l_tile * 4)                     # f32 accumulator
    return bufs + temps


def _pick_l_tile(l_out, halo_blk, max_l_tile, fits):
    """Lane-dense output tile: power-of-two multiple of 128, >= halo_blk."""
    floor = max(128, halo_blk)
    cands = []
    t = max(max_l_tile, floor)
    while t >= floor:
        cands.append(t)
        t //= 2
    # 1) Largest tile that divides l_out exactly (no trailing slice, no waste).
    for cand in cands:
        if l_out % cand == 0 and fits(cand):
            return cand
    # 2) Largest tile whose rounding waste is < 1/8 of l_out.
    for cand in cands:
        waste = pl.cdiv(l_out, cand) * cand - l_out
        if waste * 8 <= l_out and fits(cand):
            return cand
    # 3) Smallest candidate (bounded waste / VMEM).
    return cands[-1]


# ----------------------------------------------------------------------------
# Kernel
# ----------------------------------------------------------------------------
def _dilated_conv1d_relu_kernel(x_cur_ref, x_halo_ref, w_ref, b_ref, o_ref, *,
                                kernel_size, dilation, l_tile):
    # x_cur_ref : (C_in, L_tile)       current input block
    # x_halo_ref: (C_in, halo_blk)     right-halo sliver (columns after the block)
    # w_ref     : (K, C_out_t, C_in)   tap-major weights; leading-dim index is free
    # b_ref     : (C_out_t, 1)         f32 bias
    # o_ref     : (C_out_t, L_tile)
    x_cur = x_cur_ref[...]
    # Tap 0 is lane-aligned: feed the MXU directly with no staging copy.
    acc = jnp.dot(w_ref[0], x_cur, preferred_element_type=jnp.float32)
    if kernel_size > 1:
        # Single narrow concat (L_tile + halo_blk columns) instead of stacking
        # all K taps; the remaining K-1 shifted views accumulate into acc.
        window = jnp.concatenate([x_cur, x_halo_ref[...]], axis=1)
        for kk in range(1, kernel_size):
            off = kk * dilation
            acc = acc + jnp.dot(w_ref[kk], window[:, off:off + l_tile],
                                preferred_element_type=jnp.float32)
    acc = acc + b_ref[...]
    o_ref[...] = jnp.maximum(acc, 0.0).astype(o_ref.dtype)


# ----------------------------------------------------------------------------
# Wrapper
# ----------------------------------------------------------------------------
def dilated_conv_module(x, weight, bias, *, dilation, padding,
                        compute_dtype=None, allow_xla_fallback=False):
    """Equivalent of DilatedConvModule.forward: Conv1d(dilation, padding) + ReLU.

    x:      (N, C_in, L)   NCL layout, like torch.nn.Conv1d
    weight: (C_out, C_in, K)
    bias:   (C_out,)
    """
    n, c_in, l = x.shape
    c_out, c_in_w, k = weight.shape
    assert c_in == c_in_w
    halo = dilation * (k - 1)
    l_out = l + 2 * padding - halo
    assert l_out > 0, "conv output length must be positive"

    out_dtype = x.dtype
    if compute_dtype is None:
        compute_dtype = x.dtype

    # Tiny-channel configs barely use the MXU; per-grid-step overhead dominates.
    if allow_xla_fallback and (k * c_in < 32 and c_out < 32):
        return _xla_reference(x, weight, bias, dilation=dilation, padding=padding)

    # ---- generation-dependent budgets --------------------------------------
    vmem_cap = _tpu_vmem_capacity_bytes()
    if vmem_cap >= 96 * 1024 * 1024:          # v5e / v6e: 128 MiB VMEM
        vmem_limit = 100 * 1024 * 1024
        max_l_tile = 2048 if l_out >= 8 * 2048 else 1024
    else:                                      # v7x (64 MiB) or unknown
        vmem_limit = 48 * 1024 * 1024
        max_l_tile = 512
    vmem_budget = int(0.7 * vmem_limit)

    # ---- tile selection ------------------------------------------------------
    # Halo sliver width: power-of-two multiple of 128 so it always divides l_tile.
    halo_blk = 128 * pl.next_power_of_2(pl.cdiv(max(halo, 1), 128))

    if c_out > 256 and c_out % 256 == 0:
        c_out_tile = 256        # full 256-wide MXU M-dim on v6e/v7x
    elif c_out > 128 and c_out % 128 == 0:
        c_out_tile = 128
    else:
        c_out_tile = c_out
    num_co_blocks = c_out // c_out_tile

    in_bytes = jnp.dtype(compute_dtype).itemsize
    out_bytes = jnp.dtype(out_dtype).itemsize
    fits = lambda tile: _estimate_vmem_bytes(tile, halo_blk, c_in, c_out_tile, k,
                                             in_bytes, out_bytes) <= vmem_budget
    l_tile = _pick_l_tile(l_out, halo_blk, max_l_tile, fits)
    assert halo <= halo_blk <= l_tile and l_tile % halo_blk == 0

    num_l_blocks = pl.cdiv(l_out, l_tile)
    l_out_p = num_l_blocks * l_tile
    l_in_total = num_l_blocks * l_tile + halo_blk
    right_pad = l_in_total - l - padding
    assert right_pad >= 0

    # TODO(synk): fold this pad + cast pre-pass into the kernel (manual halo DMA
    # from the unpadded activation via memory_space=pl.ANY with zero-filled
    # boundaries) to save one full HBM read+write of x for very long sequences.
    x_pad = jnp.pad(x.astype(compute_dtype),
                    ((0, 0), (0, 0), (padding, right_pad)))

    # Tap-major weights (K, C_out, C_in): indexing the leading tap axis in the
    # kernel is a pure address offset, so no in-kernel weight slicing copies.
    w_taps = jnp.transpose(weight, (2, 0, 1)).astype(compute_dtype)
    bias2d = bias.reshape(c_out, 1).astype(jnp.float32)

    halo_ratio = l_tile // halo_blk
    kernel = functools.partial(_dilated_conv1d_relu_kernel,
                               kernel_size=k, dilation=dilation, l_tile=l_tile)

    out = pl.pallas_call(
        kernel,
        out_shape=jax.ShapeDtypeStruct((n, c_out, l_out_p), out_dtype),
        # grid: (batch, L-tile, C_out-tile).  C_out innermost -> the big input
        # blocks stay resident across it; only tiny weight/bias blocks restream.
        grid=(n, num_l_blocks, num_co_blocks),
        in_specs=[
            pl.BlockSpec((None, c_in, l_tile), lambda b, j, i: (b, 0, j)),
            pl.BlockSpec((None, c_in, halo_blk),
                         lambda b, j, i: (b, 0, (j + 1) * halo_ratio)),
            pl.BlockSpec((k, c_out_tile, c_in), lambda b, j, i: (0, i, 0)),
            pl.BlockSpec((c_out_tile, 1), lambda b, j, i: (i, 0)),
        ],
        out_specs=pl.BlockSpec((None, c_out_tile, l_tile),
                               lambda b, j, i: (b, i, j)),
        compiler_params=pltpu.CompilerParams(
            dimension_semantics=("parallel", "parallel", "arbitrary"),
            vmem_limit_bytes=vmem_limit,
        ),
    )(x_pad, x_pad, w_taps, bias2d)

    if l_out_p != l_out:
        out = out[:, :, :l_out]
    return out


# ----------------------------------------------------------------------------
# Self-test
# ----------------------------------------------------------------------------
if __name__ == "__main__":
    key = jax.random.PRNGKey(0)
    kx, kw, kb, kx2, kw2, kb2 = jax.random.split(key, 6)

    # Primary config (mirrors DilatedConvModule.__init__ at small shapes).
    batch, c_in, c_out, seq_len = 2, 4, 8, 16
    k_size, dilation, padding = 3, 2, 2   # "same"-style: L_out == L

    x = jax.random.normal(kx, (batch, c_in, seq_len), dtype=jnp.float32)
    w = jax.random.normal(kw, (c_out, c_in, k_size), dtype=jnp.float32) * 0.1
    b = jax.random.normal(kb, (c_out,), dtype=jnp.float32) * 0.1

    out = jax.block_until_ready(
        dilated_conv_module(x, w, b, dilation=dilation, padding=padding))
    ref = _xla_reference(x, w, b, dilation=dilation, padding=padding)
    assert out.shape == ref.shape, (out.shape, ref.shape)
    assert jnp.allclose(out, ref, atol=1e-5, rtol=1e-5), \
        float(jnp.max(jnp.abs(out - ref)))

    # Multi L-block path: exercises the narrow halo sliver across block edges.
    x2 = jax.random.normal(kx2, (1, 8, 300), dtype=jnp.float32)
    w2 = jax.random.normal(kw2, (16, 8, 3), dtype=jnp.float32) * 0.1
    b2 = jax.random.normal(kb2, (16,), dtype=jnp.float32) * 0.1
    out2 = jax.block_until_ready(
        dilated_conv_module(x2, w2, b2, dilation=5, padding=0))
    ref2 = _xla_reference(x2, w2, b2, dilation=5, padding=0)
    assert out2.shape == ref2.shape, (out2.shape, ref2.shape)
    assert jnp.allclose(out2, ref2, atol=1e-4, rtol=1e-4), \
        float(jnp.max(jnp.abs(out2 - ref2)))

    # bf16-operand path (halves HBM traffic, native MXU rate); f32 accumulation.
    out_bf16 = jax.block_until_ready(
        dilated_conv_module(x, w, b, dilation=dilation, padding=padding,
                            compute_dtype=jnp.bfloat16))
    assert jnp.allclose(out_bf16, ref, atol=5e-2, rtol=5e-2)

    print("KERNEL_OK")
</pallas_src>

<mosaic_0001>
module attributes {stable_mosaic.version = 11 : i64} {
  func.func @_dilated_conv1d_relu_kernel(%arg0: i32, %arg1: i32, %arg2: i32, %arg3: memref<1x4x128xf32, #tpu.memory_space<vmem>>, %arg4: memref<1x4x128xf32, #tpu.memory_space<vmem>>, %arg5: memref<3x8x4xf32, #tpu.memory_space<vmem>>, %arg6: memref<8x1xf32, #tpu.memory_space<vmem>>, %arg7: memref<1x8x128xf32, #tpu.memory_space<vmem>>) attributes {dimension_semantics = [#tpu.dimension_semantics<parallel>, #tpu.dimension_semantics<parallel>, #tpu.dimension_semantics<arbitrary>], iteration_bounds = array<i64: 2, 1, 1>, scalar_prefetch = 0 : i64, scratch_operands = 0 : i64, tpu.core_type = #tpu.core_type<tc>, window_params = [{transform_indices = @transform_0, window_bounds = array<i64: 1, 4, 128>}, {transform_indices = @transform_1, window_bounds = array<i64: 1, 4, 128>}, {transform_indices = @transform_2, window_bounds = array<i64: 3, 8, 4>}, {transform_indices = @transform_3, window_bounds = array<i64: 8, 1>}, {transform_indices = @transform_4, window_bounds = array<i64: 1, 8, 128>}]} {
    %c0 = arith.constant 0 : index
    %c0_0 = arith.constant 0 : index
    %c0_1 = arith.constant 0 : index
    %0 = vector.load %arg3[%c0, %c0_0, %c0_1] : memref<1x4x128xf32, #tpu.memory_space<vmem>>, vector<1x4x128xf32>
    %1 = vector.shape_cast %0 : vector<1x4x128xf32> to vector<4x128xf32>
    %c0_2 = arith.constant 0 : index
    %c0_3 = arith.constant 0 : index
    %c0_4 = arith.constant 0 : index
    %2 = vector.load %arg5[%c0_2, %c0_3, %c0_4] : memref<3x8x4xf32, #tpu.memory_space<vmem>>, vector<1x8x4xf32>
    %3 = vector.shape_cast %2 : vector<1x8x4xf32> to vector<8x4xf32>
    %cst = arith.constant dense<0.000000e+00> : vector<8x128xf32>
    %4 = tpu.matmul %3, %1, %cst {dimension_numbers = #tpu.dot_dimension_numbers<[1], [0], [0], [1], [0, 0, 1, 1], [], []>} : vector<8x4xf32>, vector<4x128xf32>, vector<8x128xf32> -> vector<8x128xf32>
    %c0_5 = arith.constant 0 : index
    %c0_6 = arith.constant 0 : index
    %c0_7 = arith.constant 0 : index
    %5 = vector.load %arg4[%c0_5, %c0_6, %c0_7] : memref<1x4x128xf32, #tpu.memory_space<vmem>>, vector<1x4x128xf32>
    %6 = vector.shape_cast %5 : vector<1x4x128xf32> to vector<4x128xf32>
    %7 = tpu.concatenate %1, %6 in 1 : vector<4x128xf32>, vector<4x128xf32> -> vector<4x256xf32>
    %c1 = arith.constant 1 : index
    %c0_8 = arith.constant 0 : index
    %c0_9 = arith.constant 0 : index
    %8 = vector.load %arg5[%c1, %c0_8, %c0_9] : memref<3x8x4xf32, #tpu.memory_space<vmem>>, vector<1x8x4xf32>
    %9 = vector.shape_cast %8 : vector<1x8x4xf32> to vector<8x4xf32>
    %10 = vector.extract_strided_slice %7 {offsets = [0, 2], sizes = [4, 128], strides = [1, 1]} : vector<4x256xf32> to vector<4x128xf32>
    %cst_10 = arith.constant dense<0.000000e+00> : vector<8x128xf32>
    %11 = tpu.matmul %9, %10, %cst_10 {dimension_numbers = #tpu.dot_dimension_numbers<[1], [0], [0], [1], [0, 0, 1, 1], [], []>} : vector<8x4xf32>, vector<4x128xf32>, vector<8x128xf32> -> vector<8x128xf32>
    %12 = arith.addf %4, %11 : vector<8x128xf32>
    %c2 = arith.constant 2 : index
    %c0_11 = arith.constant 0 : index
    %c0_12 = arith.constant 0 : index
    %13 = vector.load %arg5[%c2, %c0_11, %c0_12] : memref<3x8x4xf32, #tpu.memory_space<vmem>>, vector<1x8x4xf32>
    %14 = vector.shape_cast %13 : vector<1x8x4xf32> to vector<8x4xf32>
    %15 = vector.extract_strided_slice %7 {offsets = [0, 4], sizes = [4, 128], strides = [1, 1]} : vector<4x256xf32> to vector<4x128xf32>
    %cst_13 = arith.constant dense<0.000000e+00> : vector<8x128xf32>
    %16 = tpu.matmul %14, %15, %cst_13 {dimension_numbers = #tpu.dot_dimension_numbers<[1], [0], [0], [1], [0, 0, 1, 1], [], []>} : vector<8x4xf32>, vector<4x128xf32>, vector<8x128xf32> -> vector<8x128xf32>
    %17 = arith.addf %12, %16 : vector<8x128xf32>
    %c0_14 = arith.constant 0 : index
    %c0_15 = arith.constant 0 : index
    %18 = vector.load %arg6[%c0_14, %c0_15] : memref<8x1xf32, #tpu.memory_space<vmem>>, vector<8x1xf32>
    %19 = vector.broadcast %18 : vector<8x1xf32> to vector<8x128xf32>
    %20 = arith.addf %17, %19 : vector<8x128xf32>
    %cst_16 = arith.constant 0.000000e+00 : f32
    %21 = vector.broadcast %cst_16 : f32 to vector<8x128xf32>
    %22 = arith.maximumf %20, %21 : vector<8x128xf32>
    %c0_17 = arith.constant 0 : index
    %c0_18 = arith.constant 0 : index
    %c0_19 = arith.constant 0 : index
    %23 = vector.load %arg7[%c0_17, %c0_18, %c0_19] : memref<1x8x128xf32, #tpu.memory_space<vmem>>, vector<1x8x128xf32>
    %24 = vector.shape_cast %23 : vector<1x8x128xf32> to vector<8x128xf32>
    %25 = vector.shape_cast %22 : vector<8x128xf32> to vector<1x8x128xf32>
    tpu.vector_store %arg7[%c0_17, %c0_18, %c0_19], %25 {strides = array<i32>} : memref<1x8x128xf32, #tpu.memory_space<vmem>>, vector<1x8x128xf32>,
    return
  }
  func.func @transform_0(%arg0: i32, %arg1: i32, %arg2: i32) -> (i32, i32, i32) {
    %c0_i32 = arith.constant 0 : i32
    %c0_i32_0 = arith.constant 0 : i32
    return %arg0, %c0_i32, %arg1 : i32, i32, i32
  }
  func.func @transform_1(%arg0: i32, %arg1: i32, %arg2: i32) -> (i32, i32, i32) {
    %c1_i32 = arith.constant 1 : i32
    %0 = arith.addi %arg1, %c1_i32 : i32
    %c1_i32_0 = arith.constant 1 : i32
    %1 = arith.muli %0, %c1_i32_0 : i32
    %c0_i32 = arith.constant 0 : i32
    %c0_i32_1 = arith.constant 0 : i32
    return %arg0, %c0_i32, %1 : i32, i32, i32
  }
  func.func @transform_2(%arg0: i32, %arg1: i32, %arg2: i32) -> (i32, i32, i32) {
    %c0_i32 = arith.constant 0 : i32
    %c0_i32_0 = arith.constant 0 : i32
    %c0_i32_1 = arith.constant 0 : i32
    return %c0_i32, %arg2, %c0_i32_0 : i32, i32, i32
  }
  func.func @transform_3(%arg0: i32, %arg1: i32, %arg2: i32) -> (i32, i32) {
    %c0_i32 = arith.constant 0 : i32
    %c0_i32_0 = arith.constant 0 : i32
    return %arg2, %c0_i32 : i32, i32
  }
  func.func @transform_4(%arg0: i32, %arg1: i32, %arg2: i32) -> (i32, i32, i32) {
    %c0_i32 = arith.constant 0 : i32
    return %arg0, %arg2, %arg1 : i32, i32, i32
  }
}

</mosaic_0001>

<bundles_post_ra>
// kernel: tpu_custom_call.1
= control target key start
LH: loop header
LB: loop body
LE: loop exit
PB: predicated region body
PF: predicated region fallthrough
CT: control target
= control target key end

     0   :  { %9 = vsyncpa [#allocation3], 0  ;;  %s868_s0 = inlined_call_operand.vmem [shape: f32[2,4,256], index: 0, kind: input, shape index: {}]   ;;  %s869_s1 = inlined_call_operand.vmem [shape: f32[2,4,256], index: 1, kind: input, shape index: {}]   ;;  %s870_s2 = inlined_call_operand.vmem [shape: f32[3,8,4], index: 2, kind: input, shape index: {}]   ;;  %s871_s3 = inlined_call_operand.vmem [shape: f32[8,1], index: 3, kind: input, shape index: {}]   ;;  %s872_s4 = inlined_call_operand.hbm [shape: f32[2,8,128], index: 4, kind: output, shape index: {}]  }
   0x1   :  { %11 = vsyncpa [#allocation3 + $0x1], 0  ;;  %s750_s15 = smov 0   ;;  %s752_s16 = smov 0  }
   0x2   :  { %s754_s17 = smov 0   ;;  %s756_s18 = smov 0  }
   0x3   :  { %s758_s19 = smov 0   ;;  %s760_s20 = smov 0  }
   0x4 LB: > { %s554_s21 = sadd.s32 4294967295, %s720_s20   ;;  %s555_s22 = sadd.s32 4294967294, %s720_s20   ;;  %s720_s20 = sphi %s760_s20, %s17_s20   ;;  %s716_s19 = sphi %s758_s19, %s879_s19   ;;  %s712_s18 = sphi %s756_s18, %s878_s18   ;;  %s708_s17 = sphi %s754_s17, %s877_s17   ;;  %s704_s16 = sphi %s752_s16, %s876_s16   ;;  %s700_s15 = sphi %s750_s15, %s875_s15  }
   0x5   : > { %s36_s23 = sadd.s32 1, %s716_s19  ;;  %s157_s24 = sadd.s32 1, %s708_s17 }
   0x6   : > { %p38_p0 = scmp.ge.s32.totalorder %s36_s23, 2  ;;  %p167_p1 = scmp.ne.s32.totalorder %s708_s17, %s704_s16 }
   0x7   : > { %p168_p2 = scmp.eq.s32.totalorder %s554_s21, 1  ;;  %p173_p3 = scmp.ne.s32.totalorder %s704_s16, %s700_s15 }
   0x8   : > { %s881_s23 = smov (%p38_p0, %s36_s23), 0  ;;  %p174_p5 = scmp.eq.s32.totalorder %s555_s22, 1 }
   0x9   : > { %p790_p4 = por %p168_p2, %p167_p1  ;;  %s150_s26 = ssub.s32 %s716_s19, %s881_s23 }
   0xa   : > { %p560_p6 = scmp.ge.s32.totalorder %s720_s20, 1  ;;  %p155_p7 = scmp.eq.s32.totalorder %s150_s26, 0 }
   0xb   : > { %p797_p8 = por %p174_p5, %p173_p3  ;;  %p230_p9 = scmp.lt.s32.totalorder %s720_s20, 3 }
   0xc   : > { %s803_s28 = scalar_select %p155_p7, %s708_s17, %s157_s24  }
   0xd   : > { %p231_p10 = pnand %p560_p6, %p230_p9 }
   0xe   : > { %p276_p11 = scmp.lt.s32.totalorder (!%p231_p10), %s712_s18, 1  ;;  %s722_s9 = smov (!%p231_p10), 126  }
   0xf   : > { %234 = sbr.rel (%p231_p10) target bundleno = 291 (0x123), region = 36  ;;  %s723_s10 = smov (!%p231_p10), 124  }
  0x10   : > { %s273_s6 = sand.u32 (!%p231_p10), 1, %s704_s16  }
  0x11   : > { %s411_s21 = scalar_lea.sflag (!%p231_p10), [#allocation3], %s273_s6 }
  0x14   : > { %s277_s29 = scalar_select %p276_p11, %s712_s18, 1  ;;  %vm319_vm0 = vcmask 1043456   ;;  %vm315_vm1 = vcmask 31744   ;;  %v303_v2 = vld [vmem:[%s870_s2] sm:$0xff]  ;;  %v724_v4 = vmov 0   ;;  %vm313_vm2 = vcmask 1031168  }
  0x15   : > { %v401_v3 = vld [vmem:[%s871_s3] sm:$0xff]  ;;  %640 = vset.pattern.permute.xlu2 %v724_v4  ;;  %641 = vset.pattern.permute.xlu0 %v724_v4  ;;  %vm373_vm3 = vcmask 1014784   ;;  %v571_v9 = vld [vmem:[%s870_s2 + $0x10] sm:$0xff]  ;;  %v566_v10 = vld [vmem:[%s870_s2 + $0x8] sm:$0xff] }
  0x16   : > { %s578_s30 = sshll.u32 %s277_s29, 3  ;;  %404 = vperm.xlu2 %640, %v401_v3   ;;  %s662_s29 = scalar_lea.hbm %s872_s4, 16 }
  0x17   : > { %s283_s7 = scalar_lea.vmem %s868_s0, %s578_s30  ;;  %s580_s8 = sadd.s32 4, %s578_s30 }
  0x18   : > { %v302_v0 = vld [vmem:[%s283_s7] sm:$0xf]  ;;  %s292_s13 = scalar_lea.vmem %s869_s1, %s580_s8  ;;  %s561_s7 = sshll.u32 %s273_s6, 3 }
  0x19   : > { %309 = vrot.lane.b32.xlu1 %v302_v0, %s722_s9  ;;  %369 = vrot.lane.b32.xlu0 %v302_v0, %s723_s10  ;;  %v304_v1 = vld [vmem:[%s292_s13] sm:$0xf]  ;;  %s575_s8 = sshll.u32 %s712_s18, 3  ;;  %s275_s12 = scalar_lea.vmem [#allocation2], %s561_s7 }
  0x1a   : > { %569 = vmatpush.msk.msra.mxu1 %vm319_vm0, %v302_v0  ;;  %s423_s11 = scalar_lea.hbm %s872_s4, %s575_s8  ;;  %s425_s13 = sshll.u32 %s275_s12, 4  ;;  %s426_s13 = int_to_ptr.vmem [resolvable:$true] %s425_s13 }
  0x1b   : > { %570 = vmatmul.msk.f32.vlgmr.msra.gmra.mxu1 %vm315_vm1, %v303_v2  ;;  %s427_s14 = sshll.u32 %s423_s11, 4  ;;  %s428_s14 = int_to_ptr.hbm [resolvable:$true] %s427_s14 }
  0x1c   : > { %s656_s22 = sshra.s32 %s428_s14, 4  ;;  %s657_s22 = int_to_ptr.hbm [resolvable:$true] %s656_s22 }
  0x1d   : > { %s658_s18 = scalar_lea.hbm %s657_s22, 8  ;;  %p663_p1 = scmp.lt.s32.totalorder %s657_s22, %s872_s4 }
  0x1e   : > { %p659_p12 = scmp.ne.s32.totalorder %s657_s22, %s658_s18  ;;  %p664_p2 = scmp.lt.s32.totalorder %s662_s29, %s658_s18 }
  0x20   : > { %p660_p13 = pnand %p659_p12, %p790_p4  ;;  %p665_p3 = por %p664_p2, %p663_p1 }
  0x21   : > { %311 = vrot.lane.b32.xlu1 %v304_v1, %s722_s9  ;;  %371 = vrot.lane.b32.xlu0 %v304_v1, %s723_s10 }
  0x22   : > { %p661_p0 = pneg %p660_p13 }
  0x24   : > { %p666_p5 = pnand %p665_p3, %p661_p0 }
  0x70   : > { %v405_v17 = vpop.permute.xlu2 %404 }
  0x8b   : > { %v310_v5 = vpop.permute.xlu1 %309  ;;  %v370_v6 = vpop.permute.xlu0 %369 }
  0x93   : > { %v312_v7 = vpop.permute.xlu1 %311  ;;  %v372_v8 = vpop.permute.xlu0 %371 }
  0x94   : > { %v314_v11 = vsel %vm313_vm2, %v310_v5, %v312_v7  ;;  %v374_v12 = vsel %vm373_vm3, %v370_v6, %v372_v8 }
  0x95   : > { %567 = vmatpush.msk.msra.mxu0 %vm319_vm0, %v314_v11  ;;  %572 = vmatpush.msk.msra.mxu2 %vm319_vm0, %v374_v12 }
  0x96   : > { %573 = vmatmul.msk.f32.vlgmr.msra.gmra.mxu2 %vm315_vm1, %v571_v9  ;;  %568 = vmatmul.msk.f32.vlgmr.msra.gmra.mxu0 %vm315_vm1, %v566_v10 }
  0x98   : > { %v364_v14 = vpop.f32.mrf.mxu1 }
 0x113   : > { %v339_v13 = vpop.f32.mrf.mxu0 }
 0x114   : > { %v365_v15 = vadd.f32 %v364_v14, %v339_v13 }
 0x119   : > { %v397_v16 = vpop.f32.mrf.mxu2 }
 0x11a   : > { %v400_v18 = vadd.f32 %v397_v16, %v365_v15 }
 0x11c   : > { %v407_v19 = vadd.f32 %v405_v17, %v400_v18 }
 0x11e   : > { %v408_v20 = vmax.f32 %v407_v19, 0.0 }
 0x120   : > { %409 = vst [vmem:[%s275_s12] sm:$0xff] %v408_v20 }
 0x121   : > { %669 = shalt.err (!%p666_p5)
}
 0x122   : > { %582 = dma.vmem_to_hbm [thread:$0]  (%p790_p4), %s426_s13, 128, %s428_s14, %s411_s21  }
 0x123 PF: > { %p588_p6 = scmp.ge.s32.totalorder %s720_s20, 2  ;;  %s439_s6 = sand.u32 1, %s700_s15  }
 0x124   : > { %s440_s7 = scalar_lea.sflag [#allocation3], %s439_s6 }
 0x125   : > { %p585_p7 = pnand %p588_p6, %p797_p8 }
 0x127   : > { %p586_p9 = pneg %p585_p7 }
 0x129   : > { %695 = dma.done.wait (%p586_p9), %s440_s7, 128  }
 0x12a   : > { %697 = vsyncadd (%p586_p9), %s440_s7, 4294967168  ;;  %s17_s20 = sadd.s32 1, %s720_s20   ;;  %s875_s15 = smov %s704_s16 }
 0x12b   : > { %p14_p10 = scmp.ge.s32.totalorder %s17_s20, 4   ;;  %s876_s16 = smov %s708_s17 }
 0x12c   : > { %s877_s17 = smov %s803_s28  ;;  %s878_s18 = smov %s716_s19 }
 0x12d   : > { %s879_s19 = smov %s881_s23  ;;  %16 = sbr.rel (!%p14_p10) target bundleno = 4 (0x4), region = 82 }
 0x132   :  { %446 = vsyncpa [#allocation3], 1 }
 0x133   :  { %448 = vsyncpa [#allocation3 + $0x1], 1 }

</bundles_post_ra>
